<compile_context>
chip_gen: v6e
topology: v6e:2x2x1
jax: 0.10.0
libtpu: 0.0.40
codegen_flags: <defaults>
</compile_context>

<pallas_src>
import numpy as np
import jax
import jax.numpy as jnp
from jax.experimental import pallas as pl
from jax.experimental.pallas import tpu as pltpu

VMEM_LIMIT = 32 * 1024 * 1024  # v7x-safe (64 MiB physical / 32 MiB scoped default)


# ----------------------------- config -------------------------------------- #
class Cfg:
    # mirrors cfg.radius / cfg.stride / cfg.level of the PyTorch module
    radius = (1, 1)
    stride = (1, 2)
    level = (0, 1)


def build_points(cfg):
    """Replicates CorrLookupX.__init__ point-set construction (sorted tuples)."""
    pts, order, max_lvl = {}, [], 0
    for r, s, lvl in zip(cfg.radius, cfg.stride, cfg.level):
        max_lvl = lvl
        if lvl not in pts:
            pts[lvl] = set()
            order.append(lvl)
        for x in range(-r, r + 1):
            for y in range(-r, r + 1):
                pts[lvl].add((x * s, y * s))
    out = {lvl: np.asarray(sorted(pts[lvl]), dtype=np.float32) for lvl in order}
    n_levels = max_lvl + 1
    corr_dim = 2 * sum(v.shape[0] for v in out.values())
    return out, order, n_levels, corr_dim


def axis_interp_weights(full_size, lvl, pts_axis):
    """1-D bilinear weights of grid_sample(align_corners=False, padding='zeros')
    on the level-`lvl` pooled axis.  Sample position for query pixel q and
    point displacement p is (q + 0.5) / 2**lvl + p - 0.5 (level-lvl pixels).
    Returns float32 (full_size, n_points, full_size >> lvl).
    NOTE: assumes make_grids/to_relative produce the standard
    align_corners=False pixel-center grid ((2q+1)/size - 1)."""
    size_l = full_size >> lvl
    q = np.arange(full_size, dtype=np.float64)
    pos = (q[:, None] + 0.5) / (1 << lvl) + pts_axis[None, :].astype(np.float64) - 0.5
    i0 = np.floor(pos).astype(np.int64)
    f = pos - i0
    i1 = i0 + 1
    ii = np.arange(size_l)[None, None, :]
    w = np.where(i0[..., None] == ii, (1.0 - f)[..., None], 0.0)
    w = w + np.where(i1[..., None] == ii, f[..., None], 0.0)
    return w.astype(np.float32)  # out-of-bounds corners never match -> zero pad


# --------------------- kernel 1: correlation volume ------------------------ #
def _corr_kernel(f0t_ref, f1m_ref, f1t_ref, f0m_ref, o01_ref, o10_ref):
    # corr01 tile = f0^T f1 ; corr10 tile = f1^T f0 (avoids an HBM transpose).
    # No 1/sqrt(C) scaling: the reference module uses a raw matmul.
    o01_ref[0] = jnp.dot(f0t_ref[0], f1m_ref[0], preferred_element_type=jnp.float32)
    o10_ref[0] = jnp.dot(f1t_ref[0], f0m_ref[0], preferred_element_type=jnp.float32)


def corr_volume(f0t, f1m, f1t, f0m, tile=512, compute_dtype=jnp.float32):
    # f0t/f1t: (B, HW, C), f0m/f1m: (B, C, HW) -> corr01, corr10: (B, HW, HW)
    B, HW, C = f0t.shape
    tm = tn = min(tile, HW)
    assert HW % tm == 0, "HW must be divisible by the corr tile size"
    if compute_dtype != jnp.float32:  # optional bf16 MXU operands (v6e/v7x)
        f0t, f1m, f1t, f0m = (a.astype(compute_dtype) for a in (f0t, f1m, f1t, f0m))
    out_sd = jax.ShapeDtypeStruct((B, HW, HW), jnp.float32)
    return pl.pallas_call(
        _corr_kernel,
        out_shape=(out_sd, out_sd),
        grid_spec=pltpu.PrefetchScalarGridSpec(
            num_scalar_prefetch=0,
            grid=(B, HW // tm, HW // tn),
            in_specs=[
                pl.BlockSpec((1, tm, C), lambda b, i, j: (b, i, 0)),
                pl.BlockSpec((1, C, tn), lambda b, i, j: (b, 0, j)),
                pl.BlockSpec((1, tn, C), lambda b, i, j: (b, j, 0)),
                pl.BlockSpec((1, C, tm), lambda b, i, j: (b, 0, i)),
            ],
            out_specs=(
                pl.BlockSpec((1, tm, tn), lambda b, i, j: (b, i, j)),
                pl.BlockSpec((1, tn, tm), lambda b, i, j: (b, j, i)),
            ),
        ),
        compiler_params=pltpu.CompilerParams(
            dimension_semantics=("parallel", "parallel", "parallel"),
            vmem_limit_bytes=VMEM_LIMIT),
    )(f0t, f1m, f1t, f0m)


# --------------------- kernel 2: static bilinear lookup --------------------- #
def _lookup_kernel(c01_ref, c10_ref, ay_ref, ax_ref, o01_ref, o10_ref):
    # c: (1, TH, W, h, w); ay: (TH, n, h); ax: (W, n, w); out: (1, TH, n*W)
    c01 = c01_ref[0]
    c10 = c10_ref[0]
    ay = ay_ref[...]
    ax = ax_ref[...]
    n = ay.shape[1]

    def sample(c):
        cols = []
        for p in range(n):                      # static unroll, n is small (9)
            axp = ax[:, p, :]                   # (W, w)
            ayp = ay[:, p, :]                   # (TH, h)
            # contract key-x (lanes), then key-y; live intermediate = 1 block.
            t = jnp.sum(c * axp[None, :, None, :], axis=-1)      # (TH, W, h)
            cols.append(jnp.sum(t * ayp[:, None, :], axis=-1))   # (TH, W)
        return jnp.concatenate(cols, axis=-1)                    # (TH, n*W) lane-dense

    o01_ref[0] = sample(c01)
    o10_ref[0] = sample(c10)


def lookup_level(c01, c10, ay, ax, th=8):
    # c01/c10: (B, H, W, h, w); ay: (H, n, h); ax: (W, n, w)
    B, H, W, h, w = c01.shape
    n = ax.shape[1]
    th = min(th, H)
    assert H % th == 0, "H must be divisible by the lookup row-tile"
    out_sd = jax.ShapeDtypeStruct((B, H, n * W), jnp.float32)
    return pl.pallas_call(
        _lookup_kernel,
        out_shape=(out_sd, out_sd),
        grid_spec=pltpu.PrefetchScalarGridSpec(
            num_scalar_prefetch=0,
            grid=(B, H // th),
            in_specs=[
                pl.BlockSpec((1, th, W, h, w), lambda b, t: (b, t, 0, 0, 0)),
                pl.BlockSpec((1, th, W, h, w), lambda b, t: (b, t, 0, 0, 0)),
                pl.BlockSpec((th, n, h), lambda b, t: (t, 0, 0)),  # ay: not B-tiled
                pl.BlockSpec((W, n, w), lambda b, t: (0, 0, 0)),
            ],
            out_specs=(
                pl.BlockSpec((1, th, n * W), lambda b, t: (b, t, 0)),
                pl.BlockSpec((1, th, n * W), lambda b, t: (b, t, 0)),
            ),
        ),
        compiler_params=pltpu.CompilerParams(
            dimension_semantics=("parallel", "parallel"),
            vmem_limit_bytes=VMEM_LIMIT),
    )(c01, c10, ay, ax)


# ---------- kernel 3: fused conv3x3+ReLU x2 + residual + LayerNorm ---------- #
def _fused_conv_ln_kernel(x_ref, w1_ref, b1_ref, w2_ref, b2_ref, g_ref, bt_ref,
                          o_ref, xp_ref, y1p_ref):
    _, H, W, C = x_ref.shape
    x = x_ref[0]                                                  # (H, W, C)

    def conv3x3_relu(pad_ref, src, w_ref, b_ref):
        # in-kernel im2col: zero-padded VMEM scratch + 9 shifted MXU dots
        pad_ref[...] = jnp.zeros_like(pad_ref)
        pad_ref[1:H + 1, 1:W + 1, :] = src
        acc = jnp.zeros((H * W, C), jnp.float32)
        for k in range(9):
            ky, kx = k // 3, k % 3
            win = pad_ref[ky:ky + H, kx:kx + W, :].reshape(H * W, C)
            acc = acc + jnp.dot(win, w_ref[k], preferred_element_type=jnp.float32)
        return jnp.maximum(acc + b_ref[...], 0.0).reshape(H, W, C)

    y1 = conv3x3_relu(xp_ref, x, w1_ref, b1_ref)
    y2 = conv3x3_relu(y1p_ref, y1, w2_ref, b2_ref)

    # residual + LayerNorm epilogue (PyTorch LN: biased var, eps=1e-5)
    z = (x + y2).reshape(H * W, C)
    mean = jnp.mean(z, axis=-1, keepdims=True)
    zc = z - mean
    var = jnp.mean(zc * zc, axis=-1, keepdims=True)
    out = zc * jax.lax.rsqrt(var + 1e-5) * g_ref[...] + bt_ref[...]
    o_ref[0] = out.reshape(H, W, C)


def fused_conv33_residual_ln(x, params):
    # x: (N, H, W, C) with N = 2*B (both correlation streams, shared weights)
    N, H, W, C = x.shape
    w1 = jnp.transpose(params["w1"], (2, 3, 1, 0)).reshape(9, C, C)
    w2 = jnp.transpose(params["w2"], (2, 3, 1, 0)).reshape(9, C, C)
    b1 = params["b1"].reshape(1, C)
    b2 = params["b2"].reshape(1, C)
    g = params["gamma"].reshape(1, C)
    bt = params["beta"].reshape(1, C)
    return pl.pallas_call(
        _fused_conv_ln_kernel,
        out_shape=jax.ShapeDtypeStruct((N, H, W, C), jnp.float32),
        grid_spec=pltpu.PrefetchScalarGridSpec(
            num_scalar_prefetch=0,
            grid=(N,),
            in_specs=[
                pl.BlockSpec((1, H, W, C), lambda i: (i, 0, 0, 0)),
                pl.BlockSpec((9, C, C), lambda i: (0, 0, 0)),     # weights resident
                pl.BlockSpec((1, C), lambda i: (0, 0)),
                pl.BlockSpec((9, C, C), lambda i: (0, 0, 0)),
                pl.BlockSpec((1, C), lambda i: (0, 0)),
                pl.BlockSpec((1, C), lambda i: (0, 0)),
                pl.BlockSpec((1, C), lambda i: (0, 0)),
            ],
            out_specs=pl.BlockSpec((1, H, W, C), lambda i: (i, 0, 0, 0)),
            scratch_shapes=[pltpu.VMEM((H + 2, W + 2, C), jnp.float32),
                            pltpu.VMEM((H + 2, W + 2, C), jnp.float32)],
        ),
        compiler_params=pltpu.CompilerParams(
            dimension_semantics=("parallel",),
            vmem_limit_bytes=VMEM_LIMIT),
    )(x, w1, b1, w2, b2, g, bt)


# ----------------------------- forward -------------------------------------- #
def corr_lookup_x_forward(f0, f1, params, cfg):
    pts, order, n_levels, corr_dim = build_points(cfg)
    c_feat = corr_dim // 2
    B, C, H, W = f0.shape
    HW = H * W

    # setup(): correlation volume — corr01 and corr10 from ONE pallas_call
    f0m = f0.reshape(B, C, HW)
    f1m = f1.reshape(B, C, HW)
    f0t = jnp.transpose(f0m, (0, 2, 1))
    f1t = jnp.transpose(f1m, (0, 2, 1))
    corr01, corr10 = corr_volume(f0t, f1m, f1t, f0m)               # (B, HW, HW) each

    # setup(): correlation pyramid (2x2 avg-pool over key dims; plain-JAX glue)
    def pyramid(corr):
        c = corr.reshape(B, H, W, H, W)
        levels = [c]
        for _ in range(n_levels - 1):
            hk, wk = levels[-1].shape[3], levels[-1].shape[4]
            levels.append(
                levels[-1].reshape(B, H, W, hk // 2, 2, wk // 2, 2).mean(axis=(4, 6)))
        return levels

    p01, p10 = pyramid(corr01), pyramid(corr10)

    # forward(): static bilinear lookup per level (Pallas kernel)
    feats01, feats10 = [], []
    for lvl in order:
        p = pts[lvl]                              # (n, 2): (dx, dy) sorted tuples
        n = p.shape[0]
        ax = jnp.asarray(axis_interp_weights(W, lvl, p[:, 0]))     # (W, n, w)
        ay = jnp.asarray(axis_interp_weights(H, lvl, p[:, 1]))     # (H, n, h)
        o01, o10 = lookup_level(p01[lvl], p10[lvl], ay, ax)        # (B, H, n*W)

        def to_feat(o):  # lane-dense slab -> (B*H*W, n)  (small wrapper transpose)
            return jnp.transpose(o.reshape(B, H, n, W), (0, 1, 3, 2)).reshape(B * H * W, n)

        feats01.append(to_feat(o01))
        feats10.append(to_feat(o10))
    corr01_f = jnp.concatenate(feats01, axis=-1)                   # (B*H*W, c_feat)
    corr10_f = jnp.concatenate(feats10, axis=-1)

    # conv33 (shared weights) + residual + LayerNorm: both streams, ONE call.
    # TODO(synk): the repo's `conv(c, c)` helper is not defined in the snippet;
    # assumed Conv2d(c, c, 3, padding=1) + ReLU.
    x2 = jnp.concatenate([corr01_f.reshape(B, H, W, c_feat),
                          corr10_f.reshape(B, H, W, c_feat)], axis=0)   # (2B,H,W,c)
    y2 = fused_conv33_residual_ln(x2, params)                           # (2B,H,W,c)

    out01 = jnp.transpose(y2[:B], (0, 3, 1, 2))
    out10 = jnp.transpose(y2[B:], (0, 3, 1, 2))
    return jnp.concatenate([out01, out10], axis=1)                      # (B, 2c, H, W)


def init_params(key, c_feat):
    k1, k2, k3, k4 = jax.random.split(key, 4)
    scale = 1.0 / np.sqrt(9 * c_feat)
    return dict(
        w1=jax.random.uniform(k1, (c_feat, c_feat, 3, 3), jnp.float32, -scale, scale),
        b1=jax.random.uniform(k2, (c_feat,), jnp.float32, -scale, scale),
        w2=jax.random.uniform(k3, (c_feat, c_feat, 3, 3), jnp.float32, -scale, scale),
        b2=jax.random.uniform(k4, (c_feat,), jnp.float32, -scale, scale),
        gamma=jnp.ones((c_feat,), jnp.float32),   # nn.LayerNorm default init
        beta=jnp.zeros((c_feat,), jnp.float32),
    )


if __name__ == "__main__":
    cfg = Cfg()
    _, _, _, corr_dim = build_points(cfg)
    c_feat = corr_dim // 2

    B, C, H, W = 2, 16, 16, 16
    key = jax.random.PRNGKey(0)
    kf0, kf1, kp = jax.random.split(key, 3)
    f0 = jax.random.normal(kf0, (B, C, H, W), jnp.float32)
    f1 = jax.random.normal(kf1, (B, C, H, W), jnp.float32)
    flow = jnp.zeros((B, 2, H, W), jnp.float32)   # ignored by forward (matches reference)
    params = init_params(kp, c_feat)

    out = corr_lookup_x_forward(f0, f1, params, cfg)
    out = jax.block_until_ready(out)
    assert out.shape == (B, corr_dim, H, W), out.shape
    assert bool(jnp.all(jnp.isfinite(out)))
    print("KERNEL_OK")
</pallas_src>

<mosaic_0001>
module attributes {stable_mosaic.version = 11 : i64} {
  func.func @_corr_kernel(%arg0: i32, %arg1: i32, %arg2: i32, %arg3: memref<1x256x16xf32, #tpu.memory_space<vmem>>, %arg4: memref<1x16x256xf32, #tpu.memory_space<vmem>>, %arg5: memref<1x256x16xf32, #tpu.memory_space<vmem>>, %arg6: memref<1x16x256xf32, #tpu.memory_space<vmem>>, %arg7: memref<1x256x256xf32, #tpu.memory_space<vmem>>, %arg8: memref<1x256x256xf32, #tpu.memory_space<vmem>>) attributes {dimension_semantics = [#tpu.dimension_semantics<parallel>, #tpu.dimension_semantics<parallel>, #tpu.dimension_semantics<parallel>], iteration_bounds = array<i64: 2, 1, 1>, scalar_prefetch = 0 : i64, scratch_operands = 0 : i64, tpu.core_type = #tpu.core_type<tc>, window_params = [{transform_indices = @transform_0, window_bounds = array<i64: 1, 256, 16>}, {transform_indices = @transform_1, window_bounds = array<i64: 1, 16, 256>}, {transform_indices = @transform_2, window_bounds = array<i64: 1, 256, 16>}, {transform_indices = @transform_3, window_bounds = array<i64: 1, 16, 256>}, {transform_indices = @transform_4, window_bounds = array<i64: 1, 256, 256>}, {transform_indices = @transform_5, window_bounds = array<i64: 1, 256, 256>}]} {
    %c0 = arith.constant 0 : index
    %c0_0 = arith.constant 0 : index
    %c0_1 = arith.constant 0 : index
    %0 = vector.load %arg3[%c0, %c0_0, %c0_1] : memref<1x256x16xf32, #tpu.memory_space<vmem>>, vector<1x256x16xf32>
    %1 = vector.shape_cast %0 : vector<1x256x16xf32> to vector<256x16xf32>
    %c0_2 = arith.constant 0 : index
    %c0_3 = arith.constant 0 : index
    %c0_4 = arith.constant 0 : index
    %2 = vector.load %arg4[%c0_2, %c0_3, %c0_4] : memref<1x16x256xf32, #tpu.memory_space<vmem>>, vector<1x16x256xf32>
    %3 = vector.shape_cast %2 : vector<1x16x256xf32> to vector<16x256xf32>
    %cst = arith.constant dense<0.000000e+00> : vector<256x256xf32>
    %4 = tpu.matmul %1, %3, %cst {dimension_numbers = #tpu.dot_dimension_numbers<[1], [0], [0], [1], [0, 0, 1, 1], [], []>} : vector<256x16xf32>, vector<16x256xf32>, vector<256x256xf32> -> vector<256x256xf32>
    %c0_5 = arith.constant 0 : index
    %c0_6 = arith.constant 0 : index
    %c0_7 = arith.constant 0 : index
    %5 = vector.load %arg7[%c0_5, %c0_6, %c0_7] : memref<1x256x256xf32, #tpu.memory_space<vmem>>, vector<1x256x256xf32>
    %6 = vector.shape_cast %5 : vector<1x256x256xf32> to vector<256x256xf32>
    %7 = vector.shape_cast %4 : vector<256x256xf32> to vector<1x256x256xf32>
    tpu.vector_store %arg7[%c0_5, %c0_6, %c0_7], %7 {strides = array<i32>} : memref<1x256x256xf32, #tpu.memory_space<vmem>>, vector<1x256x256xf32>,
    %c0_8 = arith.constant 0 : index
    %c0_9 = arith.constant 0 : index
    %c0_10 = arith.constant 0 : index
    %8 = vector.load %arg5[%c0_8, %c0_9, %c0_10] : memref<1x256x16xf32, #tpu.memory_space<vmem>>, vector<1x256x16xf32>
    %9 = vector.shape_cast %8 : vector<1x256x16xf32> to vector<256x16xf32>
    %c0_11 = arith.constant 0 : index
    %c0_12 = arith.constant 0 : index
    %c0_13 = arith.constant 0 : index
    %10 = vector.load %arg6[%c0_11, %c0_12, %c0_13] : memref<1x16x256xf32, #tpu.memory_space<vmem>>, vector<1x16x256xf32>
    %11 = vector.shape_cast %10 : vector<1x16x256xf32> to vector<16x256xf32>
    %cst_14 = arith.constant dense<0.000000e+00> : vector<256x256xf32>
    %12 = tpu.matmul %9, %11, %cst_14 {dimension_numbers = #tpu.dot_dimension_numbers<[1], [0], [0], [1], [0, 0, 1, 1], [], []>} : vector<256x16xf32>, vector<16x256xf32>, vector<256x256xf32> -> vector<256x256xf32>
    %c0_15 = arith.constant 0 : index
    %c0_16 = arith.constant 0 : index
    %c0_17 = arith.constant 0 : index
    %13 = vector.load %arg8[%c0_15, %c0_16, %c0_17] : memref<1x256x256xf32, #tpu.memory_space<vmem>>, vector<1x256x256xf32>
    %14 = vector.shape_cast %13 : vector<1x256x256xf32> to vector<256x256xf32>
    %15 = vector.shape_cast %12 : vector<256x256xf32> to vector<1x256x256xf32>
    tpu.vector_store %arg8[%c0_15, %c0_16, %c0_17], %15 {strides = array<i32>} : memref<1x256x256xf32, #tpu.memory_space<vmem>>, vector<1x256x256xf32>,
    return
  }
  func.func @transform_0(%arg0: i32, %arg1: i32, %arg2: i32) -> (i32, i32, i32) {
    %c0_i32 = arith.constant 0 : i32
    %c0_i32_0 = arith.constant 0 : i32
    return %arg0, %arg1, %c0_i32 : i32, i32, i32
  }
  func.func @transform_1(%arg0: i32, %arg1: i32, %arg2: i32) -> (i32, i32, i32) {
    %c0_i32 = arith.constant 0 : i32
    %c0_i32_0 = arith.constant 0 : i32
    return %arg0, %c0_i32, %arg2 : i32, i32, i32
  }
  func.func @transform_2(%arg0: i32, %arg1: i32, %arg2: i32) -> (i32, i32, i32) {
    %c0_i32 = arith.constant 0 : i32
    %c0_i32_0 = arith.constant 0 : i32
    return %arg0, %arg2, %c0_i32 : i32, i32, i32
  }
  func.func @transform_3(%arg0: i32, %arg1: i32, %arg2: i32) -> (i32, i32, i32) {
    %c0_i32 = arith.constant 0 : i32
    %c0_i32_0 = arith.constant 0 : i32
    return %arg0, %c0_i32, %arg1 : i32, i32, i32
  }
  func.func @transform_4(%arg0: i32, %arg1: i32, %arg2: i32) -> (i32, i32, i32) {
    %c0_i32 = arith.constant 0 : i32
    return %arg0, %arg1, %arg2 : i32, i32, i32
  }
  func.func @transform_5(%arg0: i32, %arg1: i32, %arg2: i32) -> (i32, i32, i32) {
    %c0_i32 = arith.constant 0 : i32
    return %arg0, %arg2, %arg1 : i32, i32, i32
  }
}

</mosaic_0001>

<bundles_post_ra>
// kernel: tpu_custom_call.1
= control target key start
LH: loop header
LB: loop body
LE: loop exit
PB: predicated region body
PF: predicated region fallthrough
CT: control target
= control target key end

     0   :  { %11 = vsyncpa [#allocation3], 0  ;;  %s2305_s0 = inlined_call_operand.vmem [shape: f32[2,256,16], index: 0, kind: input, shape index: {}]   ;;  %s2306_s1 = inlined_call_operand.vmem [shape: f32[2,16,256], index: 1, kind: input, shape index: {}]   ;;  %s2307_s2 = inlined_call_operand.vmem [shape: f32[2,256,16], index: 2, kind: input, shape index: {}]   ;;  %s2308_s3 = inlined_call_operand.vmem [shape: f32[2,16,256], index: 3, kind: input, shape index: {}]   ;;  %s2309_s4 = inlined_call_operand.hbm [shape: f32[2,256,256], index: 4, kind: output, shape index: {0}]   ;;  %s2310_s5 = inlined_call_operand.hbm [shape: f32[2,256,256], index: 5, kind: output, shape index: {1}]  }
   0x1   :  { %13 = vsyncpa [#allocation3 + $0x1], 0 }
   0x2   :  { %14 = vsyncpa [#allocation5], 0 }
   0x3   :  { %16 = vsyncpa [#allocation5 + $0x1], 0  ;;  %s1815_s18 = smov 0   ;;  %s1817_s19 = smov 0  }
   0x4   :  { %s1819_s20 = smov 0   ;;  %s1821_s21 = smov 0  }
   0x5   :  { %s1823_s22 = smov 0   ;;  %s1825_s23 = smov 0  }
   0x6 LB: > { %s1516_s24 = sadd.s32 4294967295, %s1778_s23   ;;  %s1517_s25 = sadd.s32 4294967294, %s1778_s23   ;;  %s1778_s23 = sphi %s1825_s23, %s22_s23   ;;  %s1774_s22 = sphi %s1823_s22, %s2317_s22   ;;  %s1770_s21 = sphi %s1821_s21, %s2316_s21   ;;  %s1766_s20 = sphi %s1819_s20, %s2315_s20   ;;  %s1762_s19 = sphi %s1817_s19, %s2314_s19   ;;  %s1758_s18 = sphi %s1815_s18, %s2313_s18  }
   0x7   : > { %s41_s26 = sadd.s32 1, %s1774_s22  ;;  %s164_s27 = sadd.s32 1, %s1766_s20 }
   0x8   : > { %p43_p0 = scmp.ge.s32.totalorder %s41_s26, 2  ;;  %p174_p1 = scmp.ne.s32.totalorder %s1766_s20, %s1762_s19 }
   0x9   : > { %p175_p2 = scmp.eq.s32.totalorder %s1516_s24, 1  ;;  %p180_p3 = scmp.ne.s32.totalorder %s1762_s19, %s1758_s18 }
   0xa   : > { %s2319_s26 = smov (%p43_p0, %s41_s26), 0  ;;  %p181_p5 = scmp.eq.s32.totalorder %s1517_s25, 1 }
   0xb   : > { %p1855_p4 = por %p175_p2, %p174_p1  ;;  %s157_s29 = ssub.s32 %s1774_s22, %s2319_s26 }
   0xc   : > { %p1520_p6 = scmp.ge.s32.totalorder %s1778_s23, 1  ;;  %p162_p7 = scmp.eq.s32.totalorder %s157_s29, 0 }
   0xd   : > { %p1862_p8 = por %p181_p5, %p180_p3  ;;  %p281_p9 = scmp.lt.s32.totalorder %s1778_s23, 3 }
   0xe   : > { %s1868_s6 = scalar_select %p162_p7, %s1766_s20, %s164_s27  }
   0xf   : > { %p282_p10 = pnand %p1520_p6, %p281_p9 }
  0x10   : > { %p346_p11 = scmp.lt.s32.totalorder (!%p282_p10), %s1770_s21, 1  ;;  %s1607_s11 = sshll.u32 (!%p282_p10), %s1770_s21, 13 }
  0x11   : > { %285 = sbr.rel (%p282_p10) target bundleno = 387 (0x183), region = 36 }
  0x16   : > { %v1780_v0 = vmov 0.0   ;;  %s347_s7 = scalar_select %p346_p11, %s1770_s21, 1  ;;  %vm425_vm0 = vcmask 130048  }
  0x17   : > { %586 = vmatprep.mubr.f32.mxu0 %v1780_v0  ;;  %1039 = vmatprep.mubr.f32.mxu1 %v1780_v0 }
  0x18   : > { %s1603_s8 = sshll.u32 %s347_s7, 8  ;;  %s1604_s9 = sshll.u32 %s347_s7, 5 }
  0x19   : > { %s1877_s12 = scalar_lea.vmem %s2305_s0, %s1603_s8  ;;  %s363_s15 = scalar_lea.vmem %s2306_s1, %s1604_s9 }
  0x1a   : > { %s1885_s24 = scalar_lea.vmem %s2307_s2, %s1603_s8  ;;  %v424_v1 = vld [vmem:[%s363_s15 + $0x18] sm:$0xff]  ;;  %s383_s29 = scalar_lea.vmem %s2308_s3, %s1604_s9  ;;  %v423_v2 = vld [vmem:[%s363_s15 + $0x10] sm:$0xff]  ;;  %v422_v3 = vld [vmem:[%s363_s15 + $0x8] sm:$0xff] }
  0x1b   : > { %550 = vmatprep.subr.mxu0 %v424_v1  ;;  %v878_v4 = vld [vmem:[%s383_s29 + $0x18] sm:$0xff]  ;;  %v877_v5 = vld [vmem:[%s383_s29 + $0x10] sm:$0xff]  ;;  %v876_v6 = vld [vmem:[%s383_s29 + $0x8] sm:$0xff]  ;;  %s2081_s7 = sand.u32 1, %s1762_s19  }
  0x1c   : > { %1003 = vmatprep.subr.mxu1 %v878_v4  ;;  %551 = vmatpush1.msra.mxu0 %v423_v2  ;;  %v421_v7 = vld [vmem:[%s363_s15] sm:$0xff]  ;;  %v390_v11 = vld [vmem:[%s1877_s12 + $0x8] sm:$0xff]  ;;  %v391_v13 = vld [vmem:[%s1877_s12 + $0x10] sm:$0xff]  ;;  %s1521_s8 = sshll.u32 %s2081_s7, 9  ;;  %s2216_s15 = scalar_lea.hbm %s2309_s4, %s1607_s11 }
  0x1d   : > { %v875_v8 = vld [vmem:[%s383_s29] sm:$0xff]  ;;  %1004 = vmatpush1.msra.mxu1 %v877_v5  ;;  %552 = vmatprep.subr.mxu0 %v422_v3  ;;  %v844_v12 = vld [vmem:[%s1885_s24 + $0x8] sm:$0xff]  ;;  %v845_v14 = vld [vmem:[%s1885_s24 + $0x10] sm:$0xff]  ;;  %s2084_s9 = scalar_lea.vmem [#allocation2], %s1521_s8  ;;  %s2087_s10 = scalar_lea.vmem [#allocation4], %s1521_s8 }
  0x1e   : > { %v389_v9 = vld [vmem:[%s1877_s12] sm:$0xff]  ;;  %1005 = vmatprep.subr.mxu1 %v876_v6  ;;  %553 = vmatpush1.msra.mxu0 %v421_v7  ;;  %v392_v15 = vld [vmem:[%s1877_s12 + $0x18] sm:$0xff]  ;;  %v394_v19 = vld [vmem:[%s1877_s12 + $0x28] sm:$0xff]  ;;  %s1341_s16 = sshll.u32 %s2087_s10, 4  ;;  %s1297_s25 = scalar_lea.sflag [#allocation3], %s2081_s7  ;;  %s2229_s16 = int_to_ptr.vmem [resolvable:$true] %s1341_s16 }
  0x1f   : > { %v843_v10 = vld [vmem:[%s1885_s24] sm:$0xff]  ;;  %1006 = vmatpush1.msra.mxu1 %v875_v8  ;;  %1531 = vmatmul.mubr.msk.f32.vlgmr.msra.gmra.mxu0 %vm425_vm0, %v389_v9  ;;  %v846_v16 = vld [vmem:[%s1885_s24 + $0x18] sm:$0xff]  ;;  %v848_v20 = vld [vmem:[%s1885_s24 + $0x28] sm:$0xff]  ;;  %s1781_s29 = smov [#allocation2]  }
  0x20   : > { %1563 = vmatmul.mubr.msk.f32.vlgmr.msra.gmra.mxu1 %vm425_vm0, %v843_v10  ;;  %592 = vmatprep.mubr.f32.mxu0 %v1780_v0  ;;  %v393_v17 = vld [vmem:[%s1877_s12 + $0x20] sm:$0xff]  ;;  %v395_v21 = vld [vmem:[%s1877_s12 + $0x30] sm:$0xff]  ;;  %v396_v23 = vld [vmem:[%s1877_s12 + $0x38] sm:$0xff]  ;;  %s1676_s8 = sshll.u32 %s1781_s29, 4  ;;  %s1677_s8 = int_to_ptr.vmem [resolvable:$false] %s1676_s8 }
  0x21   : > { %1045 = vmatprep.mubr.f32.mxu1 %v1780_v0  ;;  %v847_v18 = vld [vmem:[%s1885_s24 + $0x20] sm:$0xff]  ;;  %v849_v22 = vld [vmem:[%s1885_s24 + $0x30] sm:$0xff]  ;;  %v850_v24 = vld [vmem:[%s1885_s24 + $0x38] sm:$0xff]  ;;  %s1678_s13 = scalar_lea.vmem %s1677_s8, 16384 }
  0x22   : > { %v397_v25 = vld [vmem:[%s1877_s12 + $0x40] sm:$0xff]  ;;  %v398_v27 = vld [vmem:[%s1877_s12 + $0x48] sm:$0xff]  ;;  %v399_v29 = vld [vmem:[%s1877_s12 + $0x50] sm:$0xff] }
  0x23   : > { %1532 = vmatmul.mubr.msk.f32.gmra.mxu0 %vm425_vm0, %v390_v11  ;;  %v851_v26 = vld [vmem:[%s1885_s24 + $0x40] sm:$0xff]  ;;  %v852_v28 = vld [vmem:[%s1885_s24 + $0x48] sm:$0xff]  ;;  %v853_v30 = vld [vmem:[%s1885_s24 + $0x50] sm:$0xff] }
  0x24   : > { %1564 = vmatmul.mubr.msk.f32.gmra.mxu1 %vm425_vm0, %v844_v12  ;;  %598 = vmatprep.mubr.f32.mxu0 %v1780_v0  ;;  %v400_v31 = vld [vmem:[%s1877_s12 + $0x58] sm:$0xff]  ;;  %v401_v33 = vld [vmem:[%s1877_s12 + $0x60] sm:$0xff]  ;;  %v402_v35 = vld [vmem:[%s1877_s12 + $0x68] sm:$0xff] }
  0x25   : > { %1051 = vmatprep.mubr.f32.mxu1 %v1780_v0  ;;  %v854_v32 = vld [vmem:[%s1885_s24 + $0x58] sm:$0xff]  ;;  %v855_v34 = vld [vmem:[%s1885_s24 + $0x60] sm:$0xff]  ;;  %v856_v36 = vld [vmem:[%s1885_s24 + $0x68] sm:$0xff] }
  0x26   : > { %v403_v37 = vld [vmem:[%s1877_s12 + $0x70] sm:$0xff]  ;;  %v404_v39 = vld [vmem:[%s1877_s12 + $0x78] sm:$0xff]  ;;  %v405_v41 = vld [vmem:[%s1877_s12 + $0x80] sm:$0xff] }
  0x27   : > { %1533 = vmatmul.mubr.msk.f32.gmra.mxu0 %vm425_vm0, %v391_v13  ;;  %v857_v38 = vld [vmem:[%s1885_s24 + $0x70] sm:$0xff]  ;;  %v858_v40 = vld [vmem:[%s1885_s24 + $0x78] sm:$0xff]  ;;  %v859_v42 = vld [vmem:[%s1885_s24 + $0x80] sm:$0xff] }
  0x28   : > { %1565 = vmatmul.mubr.msk.f32.gmra.mxu1 %vm425_vm0, %v845_v14  ;;  %604 = vmatprep.mubr.f32.mxu0 %v1780_v0  ;;  %v406_v43 = vld [vmem:[%s1877_s12 + $0x88] sm:$0xff]  ;;  %v407_v45 = vld [vmem:[%s1877_s12 + $0x90] sm:$0xff]  ;;  %v408_v47 = vld [vmem:[%s1877_s12 + $0x98] sm:$0xff] }
  0x29   : > { %1057 = vmatprep.mubr.f32.mxu1 %v1780_v0  ;;  %v860_v44 = vld [vmem:[%s1885_s24 + $0x88] sm:$0xff]  ;;  %v861_v46 = vld [vmem:[%s1885_s24 + $0x90] sm:$0xff]  ;;  %v862_v48 = vld [vmem:[%s1885_s24 + $0x98] sm:$0xff] }
  0x2a   : > { %v409_v49 = vld [vmem:[%s1877_s12 + $0xa0] sm:$0xff]  ;;  %v410_v51 = vld [vmem:[%s1877_s12 + $0xa8] sm:$0xff]  ;;  %v411_v53 = vld [vmem:[%s1877_s12 + $0xb0] sm:$0xff] }
  0x2b   : > { %1534 = vmatmul.mubr.msk.f32.gmra.mxu0 %vm425_vm0, %v392_v15  ;;  %v863_v50 = vld [vmem:[%s1885_s24 + $0xa0] sm:$0xff]  ;;  %v864_v52 = vld [vmem:[%s1885_s24 + $0xa8] sm:$0xff]  ;;  %v865_v54 = vld [vmem:[%s1885_s24 + $0xb0] sm:$0xff] }
  0x2c   : > { %1566 = vmatmul.mubr.msk.f32.gmra.mxu1 %vm425_vm0, %v846_v16  ;;  %610 = vmatprep.mubr.f32.mxu0 %v1780_v0  ;;  %v412_v55 = vld [vmem:[%s1877_s12 + $0xb8] sm:$0xff]  ;;  %v413_v57 = vld [vmem:[%s1877_s12 + $0xc0] sm:$0xff]  ;;  %v414_v59 = vld [vmem:[%s1877_s12 + $0xc8] sm:$0xff] }
  0x2d   : > { %1063 = vmatprep.mubr.f32.mxu1 %v1780_v0  ;;  %v866_v56 = vld [vmem:[%s1885_s24 + $0xb8] sm:$0xff]  ;;  %v867_v58 = vld [vmem:[%s1885_s24 + $0xc0] sm:$0xff]  ;;  %v868_v60 = vld [vmem:[%s1885_s24 + $0xc8] sm:$0xff] }
  0x2e   : > { %v415_v61 = vld [vmem:[%s1877_s12 + $0xd0] sm:$0xff]  ;;  %v416_v63 = vld [vmem:[%s1877_s12 + $0xd8] sm:$0xff]  ;;  %v417_v2 = vld [vmem:[%s1877_s12 + $0xe0] sm:$0xff] }
  0x2f   : > { %1535 = vmatmul.mubr.msk.f32.gmra.mxu0 %vm425_vm0, %v393_v17  ;;  %v869_v62 = vld [vmem:[%s1885_s24 + $0xd0] sm:$0xff]  ;;  %v870_v1 = vld [vmem:[%s1885_s24 + $0xd8] sm:$0xff]  ;;  %v871_v3 = vld [vmem:[%s1885_s24 + $0xe0] sm:$0xff] }
  0x30   : > { %1567 = vmatmul.mubr.msk.f32.gmra.mxu1 %vm425_vm0, %v847_v18  ;;  %616 = vmatprep.mubr.f32.mxu0 %v1780_v0  ;;  %v418_v4 = vld [vmem:[%s1877_s12 + $0xe8] sm:$0xff]  ;;  %v419_v6 = vld [vmem:[%s1877_s12 + $0xf0] sm:$0xff]  ;;  %v420_v8 = vld [vmem:[%s1877_s12 + $0xf8] sm:$0xff]  ;;  %s1320_s12 = sshll.u32 %s2084_s9, 4  ;;  %s2220_s12 = int_to_ptr.vmem [resolvable:$true] %s1320_s12 }
  0x31   : > { %1069 = vmatprep.mubr.f32.mxu1 %v1780_v0  ;;  %v872_v5 = vld [vmem:[%s1885_s24 + $0xe8] sm:$0xff]  ;;  %v873_v7 = vld [vmem:[%s1885_s24 + $0xf0] sm:$0xff]  ;;  %v874_v9 = vld [vmem:[%s1885_s24 + $0xf8] sm:$0xff]  ;;  %s2227_s24 = scalar_lea.hbm %s2310_s5, %s1607_s11  ;;  %s1672_s27 = scalar_lea.vmem %s2220_s12, 8192 }
  0x32   : > { %p1673_p12 = scmp.ne.s32.totalorder %s2220_s12, %s1672_s27  ;;  %p1679_p1 = scmp.lt.s32.totalorder %s2220_s12, %s1677_s8 }
  0x33   : > { %1536 = vmatmul.mubr.msk.f32.gmra.mxu0 %vm425_vm0, %v394_v19  ;;  %p1680_p2 = scmp.lt.s32.totalorder %s1678_s13, %s1672_s27 }
  0x34   : > { %1568 = vmatmul.mubr.msk.f32.gmra.mxu1 %vm425_vm0, %v848_v20  ;;  %622 = vmatprep.mubr.f32.mxu0 %v1780_v0  ;;  %p1674_p13 = pnand %p1673_p12, %p1855_p4 }
  0x35   : > { %1075 = vmatprep.mubr.f32.mxu1 %v1780_v0  ;;  %p1681_p3 = por %p1680_p2, %p1679_p1 }
  0x36   : > { %p1675_p0 = pneg %p1674_p13 }
  0x37   : > { %1537 = vmatmul.mubr.msk.f32.gmra.mxu0 %vm425_vm0, %v395_v21 }
  0x38   : > { %1569 = vmatmul.mubr.msk.f32.gmra.mxu1 %vm425_vm0, %v849_v22  ;;  %628 = vmatprep.mubr.f32.mxu0 %v1780_v0  ;;  %p1682_p5 = pnand %p1681_p3, %p1675_p0 }
  0x39   : > { %1081 = vmatprep.mubr.f32.mxu1 %v1780_v0 }
  0x3b   : > { %1538 = vmatmul.mubr.msk.f32.gmra.mxu0 %vm425_vm0, %v396_v23 }
  0x3c   : > { %1570 = vmatmul.mubr.msk.f32.gmra.mxu1 %vm425_vm0, %v850_v24  ;;  %634 = vmatprep.mubr.f32.mxu0 %v1780_v0 }
  0x3d   : > { %1087 = vmatprep.mubr.f32.mxu1 %v1780_v0 }
  0x3f   : > { %1539 = vmatmul.mubr.msk.f32.gmra.mxu0 %vm425_vm0, %v397_v25 }
  0x40   : > { %1571 = vmatmul.mubr.msk.f32.gmra.mxu1 %vm425_vm0, %v851_v26  ;;  %640 = vmatprep.mubr.f32.mxu0 %v1780_v0 }
  0x41   : > { %1093 = vmatprep.mubr.f32.mxu1 %v1780_v0 }
  0x43   : > { %1540 = vmatmul.mubr.msk.f32.gmra.mxu0 %vm425_vm0, %v398_v27 }
  0x44   : > { %1572 = vmatmul.mubr.msk.f32.gmra.mxu1 %vm425_vm0, %v852_v28  ;;  %646 = vmatprep.mubr.f32.mxu0 %v1780_v0 }
  0x45   : > { %1099 = vmatprep.mubr.f32.mxu1 %v1780_v0 }
  0x47   : > { %1541 = vmatmul.mubr.msk.f32.gmra.mxu0 %vm425_vm0, %v399_v29 }
  0x48   : > { %1573 = vmatmul.mubr.msk.f32.gmra.mxu1 %vm425_vm0, %v853_v30  ;;  %652 = vmatprep.mubr.f32.mxu0 %v1780_v0 }
  0x49   : > { %1105 = vmatprep.mubr.f32.mxu1 %v1780_v0 }
  0x4b   : > { %1542 = vmatmul.mubr.msk.f32.gmra.mxu0 %vm425_vm0, %v400_v31 }
  0x4c   : > { %1574 = vmatmul.mubr.msk.f32.gmra.mxu1 %vm425_vm0, %v854_v32  ;;  %658 = vmatprep.mubr.f32.mxu0 %v1780_v0 }
  0x4d   : > { %1111 = vmatprep.mubr.f32.mxu1 %v1780_v0 }
  0x4f   : > { %1543 = vmatmul.mubr.msk.f32.gmra.mxu0 %vm425_vm0, %v401_v33 }
  0x50   : > { %1575 = vmatmul.mubr.msk.f32.gmra.mxu1 %vm425_vm0, %v855_v34  ;;  %664 = vmatprep.mubr.f32.mxu0 %v1780_v0 }
  0x51   : > { %1117 = vmatprep.mubr.f32.mxu1 %v1780_v0 }
  0x53   : > { %1544 = vmatmul.mubr.msk.f32.gmra.mxu0 %vm425_vm0, %v402_v35 }
  0x54   : > { %1576 = vmatmul.mubr.msk.f32.gmra.mxu1 %vm425_vm0, %v856_v36  ;;  %670 = vmatprep.mubr.f32.mxu0 %v1780_v0 }
  0x55   : > { %1123 = vmatprep.mubr.f32.mxu1 %v1780_v0 }
  0x57   : > { %1545 = vmatmul.mubr.msk.f32.gmra.mxu0 %vm425_vm0, %v403_v37 }
  0x58   : > { %1577 = vmatmul.mubr.msk.f32.gmra.mxu1 %vm425_vm0, %v857_v38  ;;  %676 = vmatprep.mubr.f32.mxu0 %v1780_v0 }
  0x59   : > { %1129 = vmatprep.mubr.f32.mxu1 %v1780_v0 }
  0x5b   : > { %1546 = vmatmul.mubr.msk.f32.gmra.mxu0 %vm425_vm0, %v404_v39 }
  0x5c   : > { %1578 = vmatmul.mubr.msk.f32.gmra.mxu1 %vm425_vm0, %v858_v40  ;;  %682 = vmatprep.mubr.f32.mxu0 %v1780_v0 }
  0x5d   : > { %1135 = vmatprep.mubr.f32.mxu1 %v1780_v0 }
  0x5f   : > { %1547 = vmatmul.mubr.msk.f32.gmra.mxu0 %vm425_vm0, %v405_v41 }
  0x60   : > { %1579 = vmatmul.mubr.msk.f32.gmra.mxu1 %vm425_vm0, %v859_v42  ;;  %688 = vmatprep.mubr.f32.mxu0 %v1780_v0 }
  0x61   : > { %1141 = vmatprep.mubr.f32.mxu1 %v1780_v0 }
  0x63   : > { %1548 = vmatmul.mubr.msk.f32.gmra.mxu0 %vm425_vm0, %v406_v43 }
  0x64   : > { %1580 = vmatmul.mubr.msk.f32.gmra.mxu1 %vm425_vm0, %v860_v44  ;;  %694 = vmatprep.mubr.f32.mxu0 %v1780_v0 }
  0x65   : > { %1147 = vmatprep.mubr.f32.mxu1 %v1780_v0 }
  0x67   : > { %1549 = vmatmul.mubr.msk.f32.gmra.mxu0 %vm425_vm0, %v407_v45 }
  0x68   : > { %1581 = vmatmul.mubr.msk.f32.gmra.mxu1 %vm425_vm0, %v861_v46  ;;  %700 = vmatprep.mubr.f32.mxu0 %v1780_v0 }
  0x69   : > { %1153 = vmatprep.mubr.f32.mxu1 %v1780_v0 }
  0x6b   : > { %1550 = vmatmul.mubr.msk.f32.gmra.mxu0 %vm425_vm0, %v408_v47 }
  0x6c   : > { %1582 = vmatmul.mubr.msk.f32.gmra.mxu1 %vm425_vm0, %v862_v48  ;;  %706 = vmatprep.mubr.f32.mxu0 %v1780_v0 }
  0x6d   : > { %1159 = vmatprep.mubr.f32.mxu1 %v1780_v0 }
  0x6f   : > { %1551 = vmatmul.mubr.msk.f32.gmra.mxu0 %vm425_vm0, %v409_v49 }
  0x70   : > { %1583 = vmatmul.mubr.msk.f32.gmra.mxu1 %vm425_vm0, %v863_v50  ;;  %712 = vmatprep.mubr.f32.mxu0 %v1780_v0 }
  0x71   : > { %1165 = vmatprep.mubr.f32.mxu1 %v1780_v0 }
  0x73   : > { %1552 = vmatmul.mubr.msk.f32.gmra.mxu0 %vm425_vm0, %v410_v51 }
  0x74   : > { %1584 = vmatmul.mubr.msk.f32.gmra.mxu1 %vm425_vm0, %v864_v52  ;;  %718 = vmatprep.mubr.f32.mxu0 %v1780_v0 }
  0x75   : > { %1171 = vmatprep.mubr.f32.mxu1 %v1780_v0 }
  0x77   : > { %1553 = vmatmul.mubr.msk.f32.gmra.mxu0 %vm425_vm0, %v411_v53 }
  0x78   : > { %1585 = vmatmul.mubr.msk.f32.gmra.mxu1 %vm425_vm0, %v865_v54  ;;  %724 = vmatprep.mubr.f32.mxu0 %v1780_v0 }
  0x79   : > { %1177 = vmatprep.mubr.f32.mxu1 %v1780_v0 }
  0x7b   : > { %1554 = vmatmul.mubr.msk.f32.gmra.mxu0 %vm425_vm0, %v412_v55 }
  0x7c   : > { %1586 = vmatmul.mubr.msk.f32.gmra.mxu1 %vm425_vm0, %v866_v56  ;;  %730 = vmatprep.mubr.f32.mxu0 %v1780_v0 }
  0x7d   : > { %1183 = vmatprep.mubr.f32.mxu1 %v1780_v0 }
  0x7f   : > { %1555 = vmatmul.mubr.msk.f32.gmra.mxu0 %vm425_vm0, %v413_v57 }
  0x80   : > { %1587 = vmatmul.mubr.msk.f32.gmra.mxu1 %vm425_vm0, %v867_v58  ;;  %736 = vmatprep.mubr.f32.mxu0 %v1780_v0 }
  0x81   : > { %1189 = vmatprep.mubr.f32.mxu1 %v1780_v0 }
  0x83   : > { %1556 = vmatmul.mubr.msk.f32.gmra.mxu0 %vm425_vm0, %v414_v59 }
  0x84   : > { %1588 = vmatmul.mubr.msk.f32.gmra.mxu1 %vm425_vm0, %v868_v60  ;;  %742 = vmatprep.mubr.f32.mxu0 %v1780_v0 }
  0x85   : > { %1195 = vmatprep.mubr.f32.mxu1 %v1780_v0 }
  0x87   : > { %1557 = vmatmul.mubr.msk.f32.gmra.mxu0 %vm425_vm0, %v415_v61 }
  0x88   : > { %1589 = vmatmul.mubr.msk.f32.gmra.mxu1 %vm425_vm0, %v869_v62  ;;  %748 = vmatprep.mubr.f32.mxu0 %v1780_v0 }
  0x89   : > { %1201 = vmatprep.mubr.f32.mxu1 %v1780_v0 }
  0x8b   : > { %1558 = vmatmul.mubr.msk.f32.gmra.mxu0 %vm425_vm0, %v416_v63 }
  0x8c   : > { %1590 = vmatmul.mubr.msk.f32.gmra.mxu1 %vm425_vm0, %v870_v1  ;;  %754 = vmatprep.mubr.f32.mxu0 %v1780_v0 }
  0x8d   : > { %1207 = vmatprep.mubr.f32.mxu1 %v1780_v0 }
  0x8f   : > { %1559 = vmatmul.mubr.msk.f32.gmra.mxu0 %vm425_vm0, %v417_v2 }
  0x90   : > { %1591 = vmatmul.mubr.msk.f32.gmra.mxu1 %vm425_vm0, %v871_v3  ;;  %760 = vmatprep.mubr.f32.mxu0 %v1780_v0 }
  0x91   : > { %1213 = vmatprep.mubr.f32.mxu1 %v1780_v0 }
  0x93   : > { %1560 = vmatmul.mubr.msk.f32.gmra.mxu0 %vm425_vm0, %v418_v4 }
  0x94   : > { %1592 = vmatmul.mubr.msk.f32.gmra.mxu1 %vm425_vm0, %v872_v5  ;;  %766 = vmatprep.mubr.f32.mxu0 %v1780_v0 }
  0x95   : > { %1219 = vmatprep.mubr.f32.mxu1 %v1780_v0 }
  0x97   : > { %1561 = vmatmul.mubr.msk.f32.gmra.mxu0 %vm425_vm0, %v419_v6 }
  0x98   : > { %1593 = vmatmul.mubr.msk.f32.gmra.mxu1 %vm425_vm0, %v873_v7  ;;  %772 = vmatprep.mubr.f32.mxu0 %v1780_v0 }
  0x99   : > { %1225 = vmatprep.mubr.f32.mxu1 %v1780_v0 }
  0x9b   : > { %1562 = vmatmul.mubr.msk.f32.gmra.mxu0 %vm425_vm0, %v420_v8 }
  0x9c   : > { %1594 = vmatmul.mubr.msk.f32.gmra.mxu1 %vm425_vm0, %v874_v9 }
  0xdf   : > { %v588_v10 = vpop.f32.mrf.mxu0 }
  0xe0   : > { %779 = vst [vmem:[%s2084_s9] sm:$0xff] %v588_v10  ;;  %v1041_v11 = vpop.f32.mrf.mxu1 }
  0xe1   : > { %1232 = vst [vmem:[%s2087_s10] sm:$0xff] %v1041_v11  ;;  %v590_v0 = vpop.f32.mrf.mxu0 }
  0xe2   : > { %780 = vst [vmem:[%s2084_s9 + $0x8] sm:$0xff] %v590_v0  ;;  %v1043_v12 = vpop.f32.mrf.mxu1 }
  0xe3   : > { %1233 = vst [vmem:[%s2087_s10 + $0x8] sm:$0xff] %v1043_v12  ;;  %v594_v13 = vpop.f32.mrf.mxu0 }
  0xe4   : > { %781 = vst [vmem:[%s2084_s9 + $0x10] sm:$0xff] %v594_v13  ;;  %v1047_v14 = vpop.f32.mrf.mxu1 }
  0xe5   : > { %1234 = vst [vmem:[%s2087_s10 + $0x10] sm:$0xff] %v1047_v14  ;;  %v596_v15 = vpop.f32.mrf.mxu0 }
  0xe6   : > { %782 = vst [vmem:[%s2084_s9 + $0x18] sm:$0xff] %v596_v15  ;;  %v1049_v16 = vpop.f32.mrf.mxu1 }
  0xe7   : > { %1235 = vst [vmem:[%s2087_s10 + $0x18] sm:$0xff] %v1049_v16  ;;  %v600_v17 = vpop.f32.mrf.mxu0 }
  0xe8   : > { %783 = vst [vmem:[%s2084_s9 + $0x20] sm:$0xff] %v600_v17  ;;  %v1053_v18 = vpop.f32.mrf.mxu1 }
  0xe9   : > { %1236 = vst [vmem:[%s2087_s10 + $0x20] sm:$0xff] %v1053_v18  ;;  %v602_v19 = vpop.f32.mrf.mxu0 }
  0xea   : > { %784 = vst [vmem:[%s2084_s9 + $0x28] sm:$0xff] %v602_v19  ;;  %v1055_v20 = vpop.f32.mrf.mxu1 }
  0xeb   : > { %1237 = vst [vmem:[%s2087_s10 + $0x28] sm:$0xff] %v1055_v20  ;;  %v606_v21 = vpop.f32.mrf.mxu0 }
  0xec   : > { %785 = vst [vmem:[%s2084_s9 + $0x30] sm:$0xff] %v606_v21  ;;  %v1059_v22 = vpop.f32.mrf.mxu1 }
  0xed   : > { %1238 = vst [vmem:[%s2087_s10 + $0x30] sm:$0xff] %v1059_v22  ;;  %v608_v23 = vpop.f32.mrf.mxu0 }
  0xee   : > { %786 = vst [vmem:[%s2084_s9 + $0x38] sm:$0xff] %v608_v23  ;;  %v1061_v24 = vpop.f32.mrf.mxu1 }
  0xef   : > { %1239 = vst [vmem:[%s2087_s10 + $0x38] sm:$0xff] %v1061_v24  ;;  %v612_v25 = vpop.f32.mrf.mxu0 }
  0xf0   : > { %787 = vst [vmem:[%s2084_s9 + $0x40] sm:$0xff] %v612_v25  ;;  %v1065_v26 = vpop.f32.mrf.mxu1 }
  0xf1   : > { %1240 = vst [vmem:[%s2087_s10 + $0x40] sm:$0xff] %v1065_v26  ;;  %v614_v27 = vpop.f32.mrf.mxu0 }
  0xf2   : > { %788 = vst [vmem:[%s2084_s9 + $0x48] sm:$0xff] %v614_v27  ;;  %v1067_v28 = vpop.f32.mrf.mxu1 }
  0xf3   : > { %1241 = vst [vmem:[%s2087_s10 + $0x48] sm:$0xff] %v1067_v28  ;;  %v618_v29 = vpop.f32.mrf.mxu0 }
  0xf4   : > { %789 = vst [vmem:[%s2084_s9 + $0x50] sm:$0xff] %v618_v29  ;;  %v1071_v30 = vpop.f32.mrf.mxu1 }
  0xf5   : > { %1242 = vst [vmem:[%s2087_s10 + $0x50] sm:$0xff] %v1071_v30  ;;  %v620_v31 = vpop.f32.mrf.mxu0 }
  0xf6   : > { %790 = vst [vmem:[%s2084_s9 + $0x58] sm:$0xff] %v620_v31  ;;  %v1073_v32 = vpop.f32.mrf.mxu1 }
  0xf7   : > { %1243 = vst [vmem:[%s2087_s10 + $0x58] sm:$0xff] %v1073_v32  ;;  %v624_v33 = vpop.f32.mrf.mxu0 }
  0xf8   : > { %791 = vst [vmem:[%s2084_s9 + $0x60] sm:$0xff] %v624_v33  ;;  %v1077_v34 = vpop.f32.mrf.mxu1 }
  0xf9   : > { %1244 = vst [vmem:[%s2087_s10 + $0x60] sm:$0xff] %v1077_v34  ;;  %v626_v35 = vpop.f32.mrf.mxu0 }
  0xfa   : > { %792 = vst [vmem:[%s2084_s9 + $0x68] sm:$0xff] %v626_v35  ;;  %v1079_v36 = vpop.f32.mrf.mxu1 }
  0xfb   : > { %1245 = vst [vmem:[%s2087_s10 + $0x68] sm:$0xff] %v1079_v36  ;;  %v630_v37 = vpop.f32.mrf.mxu0 }
  0xfc   : > { %793 = vst [vmem:[%s2084_s9 + $0x70] sm:$0xff] %v630_v37  ;;  %v1083_v38 = vpop.f32.mrf.mxu1 }
  0xfd   : > { %1246 = vst [vmem:[%s2087_s10 + $0x70] sm:$0xff] %v1083_v38  ;;  %v632_v39 = vpop.f32.mrf.mxu0 }
  0xfe   : > { %794 = vst [vmem:[%s2084_s9 + $0x78] sm:$0xff] %v632_v39  ;;  %v1085_v40 = vpop.f32.mrf.mxu1 }
  0xff   : > { %1247 = vst [vmem:[%s2087_s10 + $0x78] sm:$0xff] %v1085_v40  ;;  %v636_v41 = vpop.f32.mrf.mxu0 }
 0x100   : > { %795 = vst [vmem:[%s2084_s9 + $0x80] sm:$0xff] %v636_v41  ;;  %v1089_v42 = vpop.f32.mrf.mxu1 }
 0x101   : > { %1248 = vst [vmem:[%s2087_s10 + $0x80] sm:$0xff] %v1089_v42  ;;  %v638_v43 = vpop.f32.mrf.mxu0 }
 0x102   : > { %796 = vst [vmem:[%s2084_s9 + $0x88] sm:$0xff] %v638_v43  ;;  %v1091_v44 = vpop.f32.mrf.mxu1 }
 0x103   : > { %1249 = vst [vmem:[%s2087_s10 + $0x88] sm:$0xff] %v1091_v44  ;;  %v642_v45 = vpop.f32.mrf.mxu0 }
 0x104   : > { %797 = vst [vmem:[%s2084_s9 + $0x90] sm:$0xff] %v642_v45  ;;  %v1095_v46 = vpop.f32.mrf.mxu1 }
 0x105   : > { %1250 = vst [vmem:[%s2087_s10 + $0x90] sm:$0xff] %v1095_v46  ;;  %v644_v47 = vpop.f32.mrf.mxu0 }
 0x106   : > { %798 = vst [vmem:[%s2084_s9 + $0x98] sm:$0xff] %v644_v47  ;;  %v1097_v48 = vpop.f32.mrf.mxu1 }
 0x107   : > { %1251 = vst [vmem:[%s2087_s10 + $0x98] sm:$0xff] %v1097_v48  ;;  %v648_v49 = vpop.f32.mrf.mxu0 }
 0x108   : > { %799 = vst [vmem:[%s2084_s9 + $0xa0] sm:$0xff] %v648_v49  ;;  %v1101_v50 = vpop.f32.mrf.mxu1 }
 0x109   : > { %1252 = vst [vmem:[%s2087_s10 + $0xa0] sm:$0xff] %v1101_v50  ;;  %v650_v51 = vpop.f32.mrf.mxu0 }
 0x10a   : > { %800 = vst [vmem:[%s2084_s9 + $0xa8] sm:$0xff] %v650_v51  ;;  %v1103_v52 = vpop.f32.mrf.mxu1 }
 0x10b   : > { %1253 = vst [vmem:[%s2087_s10 + $0xa8] sm:$0xff] %v1103_v52  ;;  %v654_v53 = vpop.f32.mrf.mxu0 }
 0x10c   : > { %801 = vst [vmem:[%s2084_s9 + $0xb0] sm:$0xff] %v654_v53  ;;  %v1107_v54 = vpop.f32.mrf.mxu1 }
 0x10d   : > { %1254 = vst [vmem:[%s2087_s10 + $0xb0] sm:$0xff] %v1107_v54  ;;  %v656_v55 = vpop.f32.mrf.mxu0 }
 0x10e   : > { %802 = vst [vmem:[%s2084_s9 + $0xb8] sm:$0xff] %v656_v55  ;;  %v1109_v56 = vpop.f32.mrf.mxu1 }
 0x10f   : > { %1255 = vst [vmem:[%s2087_s10 + $0xb8] sm:$0xff] %v1109_v56  ;;  %v660_v57 = vpop.f32.mrf.mxu0 }
 0x110   : > { %803 = vst [vmem:[%s2084_s9 + $0xc0] sm:$0xff] %v660_v57  ;;  %v1113_v58 = vpop.f32.mrf.mxu1 }
 0x111   : > { %1256 = vst [vmem:[%s2087_s10 + $0xc0] sm:$0xff] %v1113_v58  ;;  %v662_v59 = vpop.f32.mrf.mxu0 }
 0x112   : > { %804 = vst [vmem:[%s2084_s9 + $0xc8] sm:$0xff] %v662_v59  ;;  %v1115_v60 = vpop.f32.mrf.mxu1 }
 0x113   : > { %1257 = vst [vmem:[%s2087_s10 + $0xc8] sm:$0xff] %v1115_v60  ;;  %v666_v61 = vpop.f32.mrf.mxu0 }
 0x114   : > { %805 = vst [vmem:[%s2084_s9 + $0xd0] sm:$0xff] %v666_v61  ;;  %v1119_v62 = vpop.f32.mrf.mxu1 }
 0x115   : > { %1258 = vst [vmem:[%s2087_s10 + $0xd0] sm:$0xff] %v1119_v62  ;;  %v668_v63 = vpop.f32.mrf.mxu0 }
 0x116   : > { %806 = vst [vmem:[%s2084_s9 + $0xd8] sm:$0xff] %v668_v63  ;;  %v1121_v1 = vpop.f32.mrf.mxu1 }
 0x117   : > { %1259 = vst [vmem:[%s2087_s10 + $0xd8] sm:$0xff] %v1121_v1  ;;  %v672_v2 = vpop.f32.mrf.mxu0 }
 0x118   : > { %807 = vst [vmem:[%s2084_s9 + $0xe0] sm:$0xff] %v672_v2  ;;  %v1125_v3 = vpop.f32.mrf.mxu1 }
 0x119   : > { %1260 = vst [vmem:[%s2087_s10 + $0xe0] sm:$0xff] %v1125_v3  ;;  %v674_v4 = vpop.f32.mrf.mxu0 }
 0x11a   : > { %808 = vst [vmem:[%s2084_s9 + $0xe8] sm:$0xff] %v674_v4  ;;  %v1127_v5 = vpop.f32.mrf.mxu1 }
 0x11b   : > { %1261 = vst [vmem:[%s2087_s10 + $0xe8] sm:$0xff] %v1127_v5  ;;  %v678_v6 = vpop.f32.mrf.mxu0 }
 0x11c   : > { %809 = vst [vmem:[%s2084_s9 + $0xf0] sm:$0xff] %v678_v6  ;;  %v1131_v7 = vpop.f32.mrf.mxu1 }
 0x11d   : > { %1262 = vst [vmem:[%s2087_s10 + $0xf0] sm:$0xff] %v1131_v7  ;;  %v680_v8 = vpop.f32.mrf.mxu0 }
 0x11e   : > { %810 = vst [vmem:[%s2084_s9 + $0xf8] sm:$0xff] %v680_v8  ;;  %v1133_v9 = vpop.f32.mrf.mxu1 }
 0x11f   : > { %1263 = vst [vmem:[%s2087_s10 + $0xf8] sm:$0xff] %v1133_v9  ;;  %v684_v10 = vpop.f32.mrf.mxu0 }
 0x120   : > { %811 = vst [vmem:[%s2084_s9 + $0x100] sm:$0xff] %v684_v10  ;;  %v1137_v11 = vpop.f32.mrf.mxu1 }
 0x121   : > { %1264 = vst [vmem:[%s2087_s10 + $0x100] sm:$0xff] %v1137_v11  ;;  %v686_v0 = vpop.f32.mrf.mxu0 }
 0x122   : > { %812 = vst [vmem:[%s2084_s9 + $0x108] sm:$0xff] %v686_v0  ;;  %v1139_v12 = vpop.f32.mrf.mxu1 }
 0x123   : > { %1265 = vst [vmem:[%s2087_s10 + $0x108] sm:$0xff] %v1139_v12  ;;  %v690_v13 = vpop.f32.mrf.mxu0 }
 0x124   : > { %813 = vst [vmem:[%s2084_s9 + $0x110] sm:$0xff] %v690_v13  ;;  %v1143_v14 = vpop.f32.mrf.mxu1 }
 0x125   : > { %1266 = vst [vmem:[%s2087_s10 + $0x110] sm:$0xff] %v1143_v14  ;;  %v692_v15 = vpop.f32.mrf.mxu0 }
 0x126   : > { %814 = vst [vmem:[%s2084_s9 + $0x118] sm:$0xff] %v692_v15  ;;  %v1145_v16 = vpop.f32.mrf.mxu1 }
 0x127   : > { %1267 = vst [vmem:[%s2087_s10 + $0x118] sm:$0xff] %v1145_v16  ;;  %v696_v17 = vpop.f32.mrf.mxu0 }
 0x128   : > { %815 = vst [vmem:[%s2084_s9 + $0x120] sm:$0xff] %v696_v17  ;;  %v1149_v18 = vpop.f32.mrf.mxu1 }
 0x129   : > { %1268 = vst [vmem:[%s2087_s10 + $0x120] sm:$0xff] %v1149_v18  ;;  %v698_v19 = vpop.f32.mrf.mxu0 }
 0x12a   : > { %816 = vst [vmem:[%s2084_s9 + $0x128] sm:$0xff] %v698_v19  ;;  %v1151_v20 = vpop.f32.mrf.mxu1 }
 0x12b   : > { %1269 = vst [vmem:[%s2087_s10 + $0x128] sm:$0xff] %v1151_v20  ;;  %v702_v21 = vpop.f32.mrf.mxu0 }
 0x12c   : > { %817 = vst [vmem:[%s2084_s9 + $0x130] sm:$0xff] %v702_v21  ;;  %v1155_v22 = vpop.f32.mrf.mxu1 }
 0x12d   : > { %1270 = vst [vmem:[%s2087_s10 + $0x130] sm:$0xff] %v1155_v22  ;;  %v704_v23 = vpop.f32.mrf.mxu0 }
 0x12e   : > { %818 = vst [vmem:[%s2084_s9 + $0x138] sm:$0xff] %v704_v23  ;;  %v1157_v24 = vpop.f32.mrf.mxu1 }
 0x12f   : > { %1271 = vst [vmem:[%s2087_s10 + $0x138] sm:$0xff] %v1157_v24  ;;  %v708_v25 = vpop.f32.mrf.mxu0 }
 0x130   : > { %819 = vst [vmem:[%s2084_s9 + $0x140] sm:$0xff] %v708_v25  ;;  %v1161_v26 = vpop.f32.mrf.mxu1 }
 0x131   : > { %1272 = vst [vmem:[%s2087_s10 + $0x140] sm:$0xff] %v1161_v26  ;;  %v710_v27 = vpop.f32.mrf.mxu0 }
 0x132   : > { %820 = vst [vmem:[%s2084_s9 + $0x148] sm:$0xff] %v710_v27  ;;  %v1163_v28 = vpop.f32.mrf.mxu1 }
 0x133   : > { %1273 = vst [vmem:[%s2087_s10 + $0x148] sm:$0xff] %v1163_v28  ;;  %v714_v29 = vpop.f32.mrf.mxu0 }
 0x134   : > { %821 = vst [vmem:[%s2084_s9 + $0x150] sm:$0xff] %v714_v29  ;;  %v1167_v30 = vpop.f32.mrf.mxu1 }
 0x135   : > { %1274 = vst [vmem:[%s2087_s10 + $0x150] sm:$0xff] %v1167_v30  ;;  %v716_v31 = vpop.f32.mrf.mxu0 }
 0x136   : > { %822 = vst [vmem:[%s2084_s9 + $0x158] sm:$0xff] %v716_v31  ;;  %v1169_v32 = vpop.f32.mrf.mxu1 }
 0x137   : > { %1275 = vst [vmem:[%s2087_s10 + $0x158] sm:$0xff] %v1169_v32  ;;  %v720_v33 = vpop.f32.mrf.mxu0 }
 0x138   : > { %823 = vst [vmem:[%s2084_s9 + $0x160] sm:$0xff] %v720_v33  ;;  %v1173_v34 = vpop.f32.mrf.mxu1 }
 0x139   : > { %1276 = vst [vmem:[%s2087_s10 + $0x160] sm:$0xff] %v1173_v34  ;;  %v722_v35 = vpop.f32.mrf.mxu0 }
 0x13a   : > { %824 = vst [vmem:[%s2084_s9 + $0x168] sm:$0xff] %v722_v35  ;;  %v1175_v36 = vpop.f32.mrf.mxu1 }
 0x13b   : > { %1277 = vst [vmem:[%s2087_s10 + $0x168] sm:$0xff] %v1175_v36  ;;  %v726_v37 = vpop.f32.mrf.mxu0 }
 0x13c   : > { %825 = vst [vmem:[%s2084_s9 + $0x170] sm:$0xff] %v726_v37  ;;  %v1179_v38 = vpop.f32.mrf.mxu1 }
 0x13d   : > { %1278 = vst [vmem:[%s2087_s10 + $0x170] sm:$0xff] %v1179_v38  ;;  %v728_v39 = vpop.f32.mrf.mxu0 }
 0x13e   : > { %826 = vst [vmem:[%s2084_s9 + $0x178] sm:$0xff] %v728_v39  ;;  %v1181_v40 = vpop.f32.mrf.mxu1 }
 0x13f   : > { %1279 = vst [vmem:[%s2087_s10 + $0x178] sm:$0xff] %v1181_v40  ;;  %v732_v41 = vpop.f32.mrf.mxu0 }
 0x140   : > { %827 = vst [vmem:[%s2084_s9 + $0x180] sm:$0xff] %v732_v41  ;;  %v1185_v42 = vpop.f32.mrf.mxu1 }
 0x141   : > { %1280 = vst [vmem:[%s2087_s10 + $0x180] sm:$0xff] %v1185_v42  ;;  %v734_v43 = vpop.f32.mrf.mxu0 }
 0x142   : > { %828 = vst [vmem:[%s2084_s9 + $0x188] sm:$0xff] %v734_v43  ;;  %v1187_v44 = vpop.f32.mrf.mxu1 }
 0x143   : > { %1281 = vst [vmem:[%s2087_s10 + $0x188] sm:$0xff] %v1187_v44  ;;  %v738_v45 = vpop.f32.mrf.mxu0 }
 0x144   : > { %829 = vst [vmem:[%s2084_s9 + $0x190] sm:$0xff] %v738_v45  ;;  %v1191_v46 = vpop.f32.mrf.mxu1 }
 0x145   : > { %1282 = vst [vmem:[%s2087_s10 + $0x190] sm:$0xff] %v1191_v46  ;;  %v740_v47 = vpop.f32.mrf.mxu0 }
 0x146   : > { %830 = vst [vmem:[%s2084_s9 + $0x198] sm:$0xff] %v740_v47  ;;  %v1193_v48 = vpop.f32.mrf.mxu1 }
 0x147   : > { %1283 = vst [vmem:[%s2087_s10 + $0x198] sm:$0xff] %v1193_v48  ;;  %v744_v49 = vpop.f32.mrf.mxu0 }
 0x148   : > { %831 = vst [vmem:[%s2084_s9 + $0x1a0] sm:$0xff] %v744_v49  ;;  %v1197_v50 = vpop.f32.mrf.mxu1 }
 0x149   : > { %1284 = vst [vmem:[%s2087_s10 + $0x1a0] sm:$0xff] %v1197_v50  ;;  %v746_v51 = vpop.f32.mrf.mxu0 }
 0x14a   : > { %832 = vst [vmem:[%s2084_s9 + $0x1a8] sm:$0xff] %v746_v51  ;;  %v1199_v52 = vpop.f32.mrf.mxu1 }
 0x14b   : > { %1285 = vst [vmem:[%s2087_s10 + $0x1a8] sm:$0xff] %v1199_v52  ;;  %v750_v53 = vpop.f32.mrf.mxu0 }
 0x14c   : > { %833 = vst [vmem:[%s2084_s9 + $0x1b0] sm:$0xff] %v750_v53  ;;  %v1203_v54 = vpop.f32.mrf.mxu1 }
 0x14d   : > { %1286 = vst [vmem:[%s2087_s10 + $0x1b0] sm:$0xff] %v1203_v54  ;;  %v752_v55 = vpop.f32.mrf.mxu0 }
 0x14e   : > { %834 = vst [vmem:[%s2084_s9 + $0x1b8] sm:$0xff] %v752_v55  ;;  %v1205_v56 = vpop.f32.mrf.mxu1 }
 0x14f   : > { %1287 = vst [vmem:[%s2087_s10 + $0x1b8] sm:$0xff] %v1205_v56  ;;  %v756_v57 = vpop.f32.mrf.mxu0 }
 0x150   : > { %835 = vst [vmem:[%s2084_s9 + $0x1c0] sm:$0xff] %v756_v57  ;;  %v1209_v58 = vpop.f32.mrf.mxu1 }
 0x151   : > { %1288 = vst [vmem:[%s2087_s10 + $0x1c0] sm:$0xff] %v1209_v58  ;;  %v758_v59 = vpop.f32.mrf.mxu0 }
 0x152   : > { %836 = vst [vmem:[%s2084_s9 + $0x1c8] sm:$0xff] %v758_v59  ;;  %v1211_v60 = vpop.f32.mrf.mxu1 }
 0x153   : > { %1289 = vst [vmem:[%s2087_s10 + $0x1c8] sm:$0xff] %v1211_v60  ;;  %v762_v61 = vpop.f32.mrf.mxu0 }
 0x154   : > { %837 = vst [vmem:[%s2084_s9 + $0x1d0] sm:$0xff] %v762_v61  ;;  %v1215_v62 = vpop.f32.mrf.mxu1 }
 0x155   : > { %1290 = vst [vmem:[%s2087_s10 + $0x1d0] sm:$0xff] %v1215_v62  ;;  %v764_v63 = vpop.f32.mrf.mxu0 }
 0x156   : > { %838 = vst [vmem:[%s2084_s9 + $0x1d8] sm:$0xff] %v764_v63  ;;  %v1217_v1 = vpop.f32.mrf.mxu1 }
 0x157   : > { %1291 = vst [vmem:[%s2087_s10 + $0x1d8] sm:$0xff] %v1217_v1  ;;  %v768_v2 = vpop.f32.mrf.mxu0 }
 0x158   : > { %839 = vst [vmem:[%s2084_s9 + $0x1e0] sm:$0xff] %v768_v2  ;;  %v1221_v3 = vpop.f32.mrf.mxu1 }
 0x159   : > { %1292 = vst [vmem:[%s2087_s10 + $0x1e0] sm:$0xff] %v1221_v3  ;;  %v770_v4 = vpop.f32.mrf.mxu0 }
 0x15a   : > { %840 = vst [vmem:[%s2084_s9 + $0x1e8] sm:$0xff] %v770_v4  ;;  %v1223_v5 = vpop.f32.mrf.mxu1 }
 0x15b   : > { %1293 = vst [vmem:[%s2087_s10 + $0x1e8] sm:$0xff] %v1223_v5  ;;  %v774_v6 = vpop.f32.mrf.mxu0 }
 0x15c   : > { %841 = vst [vmem:[%s2084_s9 + $0x1f0] sm:$0xff] %v774_v6  ;;  %v1227_v7 = vpop.f32.mrf.mxu1 }
 0x15d   : > { %1294 = vst [vmem:[%s2087_s10 + $0x1f0] sm:$0xff] %v1227_v7  ;;  %v776_v8 = vpop.f32.mrf.mxu0 }
 0x15e   : > { %842 = vst [vmem:[%s2084_s9 + $0x1f8] sm:$0xff] %v776_v8  ;;  %v1229_v9 = vpop.f32.mrf.mxu1 }
 0x15f   : > { %1295 = vst [vmem:[%s2087_s10 + $0x1f8] sm:$0xff] %v1229_v9 }
 0x160   : > { %1685 = shalt.err (!%p1682_p5)
}
 0x161   : > { %s1686_s9 = scalar_lea.hbm %s2216_s15, 8192  ;;  %s1690_s14 = scalar_lea.hbm %s2309_s4, 16384 }
 0x162   : > { %p1687_p6 = scmp.ne.s32.totalorder %s2216_s15, %s1686_s9  ;;  %p1691_p10 = scmp.lt.s32.totalorder %s2216_s15, %s2309_s4 }
 0x163   : > { %p1692_p11 = scmp.lt.s32.totalorder %s1690_s14, %s1686_s9 }
 0x164   : > { %p1688_p7 = pnand %p1687_p6, %p1855_p4 }
 0x165   : > { %p1693_p12 = por %p1692_p11, %p1691_p10 }
 0x166   : > { %p1689_p9 = pneg %p1688_p7 }
 0x168   : > { %p1694_p13 = pnand %p1693_p12, %p1689_p9 }
 0x16a   : > { %1697 = shalt.err (!%p1694_p13)
}
 0x16b   : > { %s1782_s27 = smov 256   ;;  %s1783_s29 = smov 16  }
 0x16c   : > { %1609 = dma.vmem_to_hbm [thread:$0]  (%p1855_p4), %s2220_s12, 8192, %s2216_s15, %s1297_s25, %s1782_s27, %s1782_s27, %s1783_s29  }
 0x16d   : > { %s1302_s8 = scalar_lea.sflag [#allocation5], %s2081_s7  ;;  %s1698_s13 = scalar_lea.vmem %s2229_s16, 8192 }
 0x16e   : > { %p1699_p0 = scmp.ne.s32.totalorder %s2229_s16, %s1698_s13  ;;  %s1784_s9 = smov [#allocation4]  }
 0x16f   : > { %s1702_s10 = sshll.u32 %s1784_s9, 4  ;;  %s1703_s10 = int_to_ptr.vmem [resolvable:$false] %s1702_s10 }
 0x170   : > { %p1700_p1 = pnand %p1699_p0, %p1855_p4  ;;  %s1704_s11 = scalar_lea.vmem %s1703_s10, 16384 }
 0x171   : > { %p1705_p3 = scmp.lt.s32.totalorder %s2229_s16, %s1703_s10  ;;  %p1706_p5 = scmp.lt.s32.totalorder %s1704_s11, %s1698_s13 }
 0x172   : > { %p1701_p2 = pneg %p1700_p1 }
 0x173   : > { %p1707_p6 = por %p1706_p5, %p1705_p3 }
 0x175   : > { %p1708_p7 = pnand %p1707_p6, %p1701_p2 }
 0x177   : > { %1711 = shalt.err (!%p1708_p7)
}
 0x178   : > { %s1712_s12 = scalar_lea.hbm %s2227_s24, 8192  ;;  %s1716_s25 = scalar_lea.hbm %s2310_s5, 16384 }
 0x179   : > { %p1713_p9 = scmp.ne.s32.totalorder %s2227_s24, %s1712_s12  ;;  %p1717_p12 = scmp.lt.s32.totalorder %s2227_s24, %s2310_s5 }
 0x17a   : > { %p1718_p13 = scmp.lt.s32.totalorder %s1716_s25, %s1712_s12 }
 0x17b   : > { %p1714_p10 = pnand %p1713_p9, %p1855_p4 }
 0x17c   : > { %p1719_p0 = por %p1718_p13, %p1717_p12 }
 0x17d   : > { %p1715_p11 = pneg %p1714_p10 }
 0x17f   : > { %p1720_p1 = pnand %p1719_p0, %p1715_p11 }
 0x181   : > { %1723 = shalt.err (!%p1720_p1)
}
 0x182   : > { %1610 = dma.vmem_to_hbm [thread:$0]  (%p1855_p4), %s2229_s16, 8192, %s2227_s24, %s1302_s8, %s1782_s27, %s1782_s27, %s1783_s29  }
 0x183 PF: > { %p1620_p2 = scmp.ge.s32.totalorder %s1778_s23, 2  ;;  %s1356_s17 = sand.u32 1, %s1758_s18  }
 0x184   : > { %s1357_s13 = scalar_lea.sflag [#allocation3], %s1356_s17 }
 0x185   : > { %p1614_p3 = pnand %p1620_p2, %p1862_p8 }
 0x187   : > { %p1615_p5 = pneg %p1614_p3 }
 0x189   : > { %1749 = dma.done.wait (%p1615_p5), %s1357_s13, 8192  }
 0x18a   : > { %1751 = vsyncadd (%p1615_p5), %s1357_s13, 4294959104  ;;  %s1366_s9 = scalar_lea.sflag [#allocation5], %s1356_s17 }
 0x18b   : > { %1753 = dma.done.wait (%p1615_p5), %s1366_s9, 8192  }
 0x18c   : > { %1755 = vsyncadd (%p1615_p5), %s1366_s9, 4294959104  ;;  %s22_s23 = sadd.s32 1, %s1778_s23   ;;  %s2313_s18 = smov %s1762_s19 }
 0x18d   : > { %p19_p6 = scmp.ge.s32.totalorder %s22_s23, 4   ;;  %s2314_s19 = smov %s1766_s20 }
 0x18e   : > { %s2315_s20 = smov %s1868_s6  ;;  %s2316_s21 = smov %s1774_s22 }
 0x18f   : > { %s2317_s22 = smov %s2319_s26  ;;  %21 = sbr.rel (!%p19_p6) target bundleno = 6 (0x6), region = 97 }
 0x194   :  { %1371 = vsyncpa [#allocation3], 1 }
 0x195   :  { %1373 = vsyncpa [#allocation3 + $0x1], 1 }
 0x196   :  { %1374 = vsyncpa [#allocation5], 1 }
 0x197   :  { %1376 = vsyncpa [#allocation5 + $0x1], 1 }

</bundles_post_ra>
